<compile_context>
chip_gen: v6e
topology: v6e:2x2x1
jax: 0.10.0
libtpu: 0.0.40
codegen_flags: <defaults>
</compile_context>

<pallas_src>
import functools

import jax
import jax.numpy as jnp
from jax import lax
from jax.experimental import pallas as pl
from jax.experimental.pallas import tpu as pltpu


def _round_up(x, m):
    return ((x + m - 1) // m) * m


def _tcl_kernel(feat_ref, tid_col_ref, tid_row_ref, out_ref, *,
                n_true, max_dist, tq, tk):
    # feat_ref:    (n_pad, D)       bf16, pre-normalized * 1/sqrt(T), resident
    # tid_col_ref: (tq, 1)          int32, temporal ids of this query tile
    # tid_row_ref: (n_pad//tk, tk)  int32, temporal ids laid out per key tile
    # out_ref:     (8, 128)         f32, per-row-tile partial sum (replicated)
    i = pl.program_id(0)

    q_start = pl.multiple_of(i * tq, 128)
    qn = feat_ref[pl.ds(q_start, tq), :]          # (tq, D) bf16, read once per i
    tid_q = tid_col_ref[...]                      # (tq, 1) int32

    nj_full = n_true // tk                        # key tiles with no padding
    rem = n_true % tk                             # valid keys in the tail tile

    def kv_step(j, carry, *, col_mask):
        m, l, spos, cpos = carry
        k_start = pl.multiple_of(j * tk, 128)
        k_blk = feat_ref[pl.ds(k_start, tk), :]               # (tk, D) bf16
        tid_k = tid_row_ref[pl.ds(j, 1), :]                   # (1, tk) int32

        # similarity already carries the 1/temperature scale
        sim = lax.dot_general(qn, k_blk, (((1,), (1,)), ((), ())),
                              preferred_element_type=jnp.float32)   # (tq, tk)

        # ---- online, max-stabilized logsumexp over valid keys ----
        # Only the (single) partially padded tail tile pays for the mask.
        sim_lse = sim if col_mask is None else jnp.where(col_mask, sim, -1e30)
        m_new = jnp.maximum(m, jnp.max(sim_lse, axis=1, keepdims=True))
        alpha = jnp.exp(m - m_new)
        l = alpha * l + jnp.sum(jnp.exp(sim_lse - m_new), axis=1, keepdims=True)

        # ---- fused positive-pair partial sums (log_prob never materialized) ----
        # Padded key columns carry tid = 2**30, so dist > max_dist already
        # excludes them; no validity mask needed on this path.
        dist = jnp.abs(tid_q - tid_k)                               # (tq, tk)
        pos = jnp.logical_and(dist <= max_dist, dist > 0)
        spos = spos + jnp.sum(jnp.where(pos, sim, 0.0), axis=1, keepdims=True)
        cpos = cpos + jnp.sum(pos.astype(jnp.float32), axis=1, keepdims=True)
        return m_new, l, spos, cpos

    carry = (jnp.full((tq, 1), -1e30, jnp.float32),   # running max m
             jnp.zeros((tq, 1), jnp.float32),          # running sum-exp l
             jnp.zeros((tq, 1), jnp.float32),          # sum of positive sims
             jnp.zeros((tq, 1), jnp.float32))          # positive count

    if nj_full > 0:   # interior key tiles: fast path, no column mask
        carry = lax.fori_loop(0, nj_full,
                              functools.partial(kv_step, col_mask=None),
                              carry)
    if rem > 0:       # single partially padded tail tile (static mask)
        col_mask = lax.broadcasted_iota(jnp.int32, (1, tk), 1) < rem
        carry = kv_step(nj_full, carry, col_mask=col_mask)

    m, l, spos, cpos = carry
    # Every processed key tile holds >= 1 valid key (all-padding tiles are
    # skipped), so l >= exp(0) > 0 and log(l) is finite.
    log_denom = m + jnp.log(l)                                       # (tq, 1)
    inv_cnt = 1.0 / jnp.maximum(cpos, 1.0)          # exact divide (tiny vector)
    # sum_pos(log_prob) = sum_pos(sim) - cnt * logsumexp(sim)
    mean_lp = (spos - cpos * log_denom) * inv_cnt
    row = i * tq + lax.broadcasted_iota(jnp.int32, (tq, 1), 0)
    tile_sum = jnp.sum(jnp.where(row < n_true, mean_lp, 0.0))
    out_ref[...] = jnp.full(out_ref.shape, tile_sum, jnp.float32)    # lane-dense


def temporal_contrastive_loss(features, temporal_ids, temperature=0.1,
                              max_temporal_distance=3, tq=512, tk=128):
    """JAX/Pallas equivalent of TemporalContrastiveLoss.forward.

    features:     [N, D] float array
    temporal_ids: [N] integer frame ids
    returns scalar float32 loss
    """
    N, D = features.shape
    if N <= 1:
        return jnp.float32(0.0)

    # ---- pre-normalize once (L2, eps=1e-12 like F.normalize), fold in
    #      1/sqrt(T), store bf16 (kernel streams these straight to the MXU) ----
    inv_sqrt_t = 1.0 / float(temperature) ** 0.5
    x = features.astype(jnp.float32)
    norm = jnp.sqrt(jnp.sum(x * x, axis=1, keepdims=True))
    xn = ((x / jnp.maximum(norm, 1e-12)) * inv_sqrt_t).astype(jnp.bfloat16)

    # ---- tiling / padding ----
    tk = _round_up(max(int(tk), 128), 128)
    tq = _round_up(max(int(tq), tk), tk)
    tq = min(tq, _round_up(_round_up(N, tk), tk))   # do not over-pad tiny inputs
    n_pad = _round_up(N, tq)
    pad = n_pad - N

    tids = temporal_ids.astype(jnp.int32)
    if pad:
        xn = jnp.pad(xn, ((0, pad), (0, 0)))
        tids = jnp.pad(tids, (0, pad), constant_values=2 ** 30)  # never a positive
    tid_col = tids.reshape(n_pad, 1)
    tid_row = tids.reshape(n_pad // tk, tk)

    num_i = n_pad // tq
    kernel = functools.partial(
        _tcl_kernel, n_true=N, max_dist=int(max_temporal_distance), tq=tq, tk=tk)

    # ---- VMEM limit from the actual footprint (not the whole machine) ----
    feat_bytes = n_pad * D * 2
    tid_row_bytes = n_pad * 4
    tid_col_bytes = tq * 128 * 4          # (tq,1) int32 pads lanes to 128 in VMEM
    out_bytes = 8 * 128 * 4
    work_bytes = 8 * tq * tk * 4          # spilled (tq, tk) f32 intermediates
    vmem_bytes = 2 * (feat_bytes + tid_row_bytes + tid_col_bytes + out_bytes) + work_bytes
    vmem_limit = int(min(48 * 1024 * 1024, max(16 * 1024 * 1024, 2 * vmem_bytes)))

    n_kcols = _round_up(N, tk)            # key columns actually visited
    out = pl.pallas_call(
        kernel,
        out_shape=jax.ShapeDtypeStruct((num_i * 8, 128), jnp.float32),
        grid_spec=pltpu.PrefetchScalarGridSpec(
            num_scalar_prefetch=0,
            grid=(num_i,),
            in_specs=[
                pl.BlockSpec((n_pad, D), lambda i: (0, 0)),        # keys: resident, DMA'd once
                pl.BlockSpec((tq, 1), lambda i: (i, 0)),           # query-tile temporal ids
                pl.BlockSpec((n_pad // tk, tk), lambda i: (0, 0)),  # key temporal ids (per tile rows)
            ],
            out_specs=pl.BlockSpec((8, 128), lambda i: (i, 0)),    # per-row-tile partial
        ),
        compiler_params=pltpu.CompilerParams(
            dimension_semantics=("parallel",),      # row tiles independent -> v7x megacore
            vmem_limit_bytes=vmem_limit,
        ),
        cost_estimate=pl.CostEstimate(
            flops=2 * n_pad * n_kcols * D,
            transcendentals=n_pad * n_kcols,
            bytes_accessed=feat_bytes + tid_row_bytes + num_i * tq * 4
            + num_i * 8 * 128 * 4,
        ),
    )(xn, tid_col, tid_row)

    tile_sums = out[::8, 0]               # one scalar per query-row tile
    return -jnp.sum(tile_sums) / N


def _reference_loss(features, temporal_ids, temperature=0.1, max_temporal_distance=3):
    """Pure-JAX f32 reference mirroring the PyTorch module."""
    x = features.astype(jnp.float32)
    norm = jnp.sqrt(jnp.sum(x * x, axis=1, keepdims=True))
    xn = x / jnp.maximum(norm, 1e-12)
    sim = (xn @ xn.T) / temperature
    log_prob = sim - jnp.log(jnp.sum(jnp.exp(sim), axis=1, keepdims=True))
    tids = temporal_ids.astype(jnp.int32)
    dists = jnp.abs(tids[:, None] - tids[None, :])
    pos = ((dists <= max_temporal_distance) & (dists > 0)).astype(jnp.float32)
    mean_lp = jnp.sum(pos * log_prob, axis=1) / jnp.maximum(jnp.sum(pos, axis=1), 1.0)
    return -jnp.mean(mean_lp)


if __name__ == "__main__":
    key = jax.random.PRNGKey(0)
    k1, k2, k3, k4 = jax.random.split(key, 4)

    # Small shapes consistent with the module: pooled per-frame descriptors.
    N, D = 16, 64
    features = jax.random.normal(k1, (N, D), dtype=jnp.float32)
    temporal_ids = jax.random.randint(k2, (N,), minval=0, maxval=8, dtype=jnp.int32)

    loss = jax.block_until_ready(
        temporal_contrastive_loss(features, temporal_ids,
                                  temperature=0.1, max_temporal_distance=3))
    ref = jax.block_until_ready(
        _reference_loss(features, temporal_ids, 0.1, 3))
    # bf16 MXU operands -> loosened tolerance.
    assert jnp.allclose(loss, ref, rtol=2e-2, atol=2e-2), (loss, ref)

    # Second shape exercising the unmasked fori_loop path + masked tail tile.
    N2 = 200
    f2 = jax.random.normal(k3, (N2, D), dtype=jnp.float32)
    t2 = jax.random.randint(k4, (N2,), minval=0, maxval=50, dtype=jnp.int32)
    loss2 = jax.block_until_ready(
        temporal_contrastive_loss(f2, t2, temperature=0.1, max_temporal_distance=3))
    ref2 = jax.block_until_ready(_reference_loss(f2, t2, 0.1, 3))
    assert jnp.allclose(loss2, ref2, rtol=2e-2, atol=2e-2), (loss2, ref2)

    print("KERNEL_OK")
</pallas_src>

<mosaic_0001>
module attributes {stable_mosaic.version = 11 : i64} {
  func.func @_tcl_kernel(%arg0: i32, %arg1: memref<128x64xbf16, #tpu.memory_space<vmem>>, %arg2: memref<128x1xi32, #tpu.memory_space<vmem>>, %arg3: memref<1x128xi32, #tpu.memory_space<vmem>>, %arg4: memref<8x128xf32, #tpu.memory_space<vmem>>) attributes {dimension_semantics = [#tpu.dimension_semantics<parallel>], iteration_bounds = array<i64: 1>, scalar_prefetch = 0 : i64, scratch_operands = 0 : i64, tpu.core_type = #tpu.core_type<tc>, window_params = [{pipeline_mode = #tpu.pipeline_mode<synchronous>, transform_indices = @transform_0, window_bounds = array<i64: 128, 64>}, {transform_indices = @transform_1, window_bounds = array<i64: 128, 1>}, {pipeline_mode = #tpu.pipeline_mode<synchronous>, transform_indices = @transform_2, window_bounds = array<i64: 1, 128>}, {transform_indices = @transform_3, window_bounds = array<i64: 8, 128>}]} {
    %c128_i32 = arith.constant 128 : i32
    %0 = arith.muli %arg0, %c128_i32 : i32
    %1 = tpu.assume_multiple %0, 128 : i32
    %2 = arith.index_cast %1 : i32 to index
    %c0 = arith.constant 0 : index
    %3 = vector.load %arg1[%2, %c0] : memref<128x64xbf16, #tpu.memory_space<vmem>>, vector<128x64xbf16>
    %c0_0 = arith.constant 0 : index
    %c0_1 = arith.constant 0 : index
    %4 = vector.load %arg2[%c0_0, %c0_1] : memref<128x1xi32, #tpu.memory_space<vmem>>, vector<128x1xi32>
    %cst = arith.constant -1.000000e+30 : f32
    %5 = vector.broadcast %cst : f32 to vector<128x1xf32>
    %cst_2 = arith.constant 0.000000e+00 : f32
    %6 = vector.broadcast %cst_2 : f32 to vector<128x1xf32>
    %cst_3 = arith.constant 0.000000e+00 : f32
    %7 = vector.broadcast %cst_3 : f32 to vector<128x1xf32>
    %cst_4 = arith.constant 0.000000e+00 : f32
    %8 = vector.broadcast %cst_4 : f32 to vector<128x1xf32>
    %9 = tpu.iota {dimensions = array<i32: 1>} : vector<1x128xi32>
    %c16_i32 = arith.constant 16 : i32
    %10 = vector.broadcast %c16_i32 : i32 to vector<1x128xi32>
    %11 = arith.cmpi slt, %9, %10 : vector<1x128xi32>
    %c0_i32 = arith.constant 0 : i32
    %12 = tpu.assume_multiple %c0_i32, 128 : i32
    %13 = arith.index_cast %12 : i32 to index
    %c0_5 = arith.constant 0 : index
    %14 = vector.load %arg1[%13, %c0_5] : memref<128x64xbf16, #tpu.memory_space<vmem>>, vector<128x64xbf16>
    %c0_6 = arith.constant 0 : index
    %c0_7 = arith.constant 0 : index
    %15 = vector.load %arg3[%c0_6, %c0_7] : memref<1x128xi32, #tpu.memory_space<vmem>>, vector<1x128xi32>
    %cst_8 = arith.constant dense<0.000000e+00> : vector<128x128xf32>
    %16 = tpu.matmul %3, %14, %cst_8 {dimension_numbers = #tpu.dot_dimension_numbers<[1], [1], [0], [0], [0, 0, 1, 0], [], []>} : vector<128x64xbf16>, vector<128x64xbf16>, vector<128x128xf32> -> vector<128x128xf32>
    %cst_9 = arith.constant -1.000000e+30 : f32
    %17 = vector.shape_cast %11 : vector<1x128xi1> to vector<1x128xi1>
    %18 = vector.broadcast %17 : vector<1x128xi1> to vector<128x128xi1>
    %19 = vector.broadcast %cst_9 : f32 to vector<128x128xf32>
    %20 = arith.select %18, %16, %19 : vector<128x128xi1>, vector<128x128xf32>
    %cst_10 = arith.constant dense<0xFF800000> : vector<128xf32>
    %21 = vector.multi_reduction <maximumf>, %20, %cst_10 [1] : vector<128x128xf32> to vector<128xf32>
    %22 = vector.shape_cast %21 : vector<128xf32> to vector<128x1xf32>
    %23 = arith.maximumf %5, %22 : vector<128x1xf32>
    %24 = arith.subf %5, %23 : vector<128x1xf32>
    %25 = math.exp %24 : vector<128x1xf32>
    %26 = arith.mulf %25, %6 : vector<128x1xf32>
    %27 = vector.broadcast %23 : vector<128x1xf32> to vector<128x128xf32>
    %28 = arith.subf %20, %27 : vector<128x128xf32>
    %29 = math.exp %28 : vector<128x128xf32>
    %cst_11 = arith.constant dense<0.000000e+00> : vector<128xf32>
    %30 = vector.multi_reduction <add>, %29, %cst_11 [1] : vector<128x128xf32> to vector<128xf32>
    %31 = vector.shape_cast %30 : vector<128xf32> to vector<128x1xf32>
    %32 = arith.addf %26, %31 : vector<128x1xf32>
    %33 = vector.broadcast %4 : vector<128x1xi32> to vector<128x128xi32>
    %34 = vector.broadcast %15 : vector<1x128xi32> to vector<128x128xi32>
    %35 = arith.subi %33, %34 : vector<128x128xi32>
    %36 = math.absi %35 : vector<128x128xi32>
    %c3_i32 = arith.constant 3 : i32
    %37 = vector.broadcast %c3_i32 : i32 to vector<128x128xi32>
    %38 = arith.cmpi sle, %36, %37 : vector<128x128xi32>
    %c0_i32_12 = arith.constant 0 : i32
    %39 = vector.broadcast %c0_i32_12 : i32 to vector<128x128xi32>
    %40 = arith.cmpi sgt, %36, %39 : vector<128x128xi32>
    %41 = arith.andi %38, %40 : vector<128x128xi1>
    %cst_13 = arith.constant 0.000000e+00 : f32
    %42 = vector.broadcast %cst_13 : f32 to vector<128x128xf32>
    %43 = arith.select %41, %16, %42 : vector<128x128xi1>, vector<128x128xf32>
    %cst_14 = arith.constant dense<0.000000e+00> : vector<128xf32>
    %44 = vector.multi_reduction <add>, %43, %cst_14 [1] : vector<128x128xf32> to vector<128xf32>
    %45 = vector.shape_cast %44 : vector<128xf32> to vector<128x1xf32>
    %46 = arith.addf %7, %45 : vector<128x1xf32>
    %47 = arith.extui %41 : vector<128x128xi1> to vector<128x128xi32>
    %48 = arith.sitofp %47 : vector<128x128xi32> to vector<128x128xf32>
    %cst_15 = arith.constant dense<0.000000e+00> : vector<128xf32>
    %49 = vector.multi_reduction <add>, %48, %cst_15 [1] : vector<128x128xf32> to vector<128xf32>
    %50 = vector.shape_cast %49 : vector<128xf32> to vector<128x1xf32>
    %51 = arith.addf %8, %50 : vector<128x1xf32>
    %52 = math.log %32 : vector<128x1xf32>
    %53 = arith.addf %23, %52 : vector<128x1xf32>
    %cst_16 = arith.constant 1.000000e+00 : f32
    %54 = vector.broadcast %cst_16 : f32 to vector<128x1xf32>
    %55 = arith.maximumf %51, %54 : vector<128x1xf32>
    %cst_17 = arith.constant 1.000000e+00 : f32
    %56 = vector.broadcast %cst_17 : f32 to vector<128x1xf32>
    %57 = arith.divf %56, %55 : vector<128x1xf32>
    %58 = arith.mulf %51, %53 : vector<128x1xf32>
    %59 = arith.subf %46, %58 : vector<128x1xf32>
    %60 = arith.mulf %59, %57 : vector<128x1xf32>
    %c128_i32_18 = arith.constant 128 : i32
    %61 = arith.muli %arg0, %c128_i32_18 : i32
    %62 = tpu.iota {dimensions = array<i32: 0>} : vector<128x1xi32>
    %63 = vector.broadcast %61 : i32 to vector<128x1xi32>
    %64 = arith.addi %63, %62 : vector<128x1xi32>
    %c16_i32_19 = arith.constant 16 : i32
    %65 = vector.broadcast %c16_i32_19 : i32 to vector<128x1xi32>
    %66 = arith.cmpi slt, %64, %65 : vector<128x1xi32>
    %cst_20 = arith.constant 0.000000e+00 : f32
    %67 = vector.broadcast %cst_20 : f32 to vector<128x1xf32>
    %68 = arith.select %66, %60, %67 : vector<128x1xi1>, vector<128x1xf32>
    %69 = vector.shape_cast %68 : vector<128x1xf32> to vector<1x128x1xf32>
    %cst_21 = arith.constant dense<0.000000e+00> : vector<1xf32>
    %70 = vector.multi_reduction <add>, %69, %cst_21 [1, 2] : vector<1x128x1xf32> to vector<1xf32>
    %71 = vector.shape_cast %70 : vector<1xf32> to vector<1x1x1xf32>
    %72 = vector.extract %71[0, 0, 0] : f32 from vector<1x1x1xf32>
    %73 = vector.broadcast %72 : f32 to vector<8x128xf32>
    %c0_22 = arith.constant 0 : index
    %c0_23 = arith.constant 0 : index
    %74 = vector.load %arg4[%c0_22, %c0_23] : memref<8x128xf32, #tpu.memory_space<vmem>>, vector<8x128xf32>
    tpu.vector_store %arg4[%c0_22, %c0_23], %73 {strides = array<i32>} : memref<8x128xf32, #tpu.memory_space<vmem>>, vector<8x128xf32>,
    return
  }
  func.func @transform_0(%arg0: i32) -> (i32, i32) {
    %c0_i32 = arith.constant 0 : i32
    %c0_i32_0 = arith.constant 0 : i32
    %c0_i32_1 = arith.constant 0 : i32
    return %c0_i32, %c0_i32_0 : i32, i32
  }
  func.func @transform_1(%arg0: i32) -> (i32, i32) {
    %c0_i32 = arith.constant 0 : i32
    %c0_i32_0 = arith.constant 0 : i32
    return %arg0, %c0_i32 : i32, i32
  }
  func.func @transform_2(%arg0: i32) -> (i32, i32) {
    %c0_i32 = arith.constant 0 : i32
    %c0_i32_0 = arith.constant 0 : i32
    %c0_i32_1 = arith.constant 0 : i32
    return %c0_i32, %c0_i32_0 : i32, i32
  }
  func.func @transform_3(%arg0: i32) -> (i32, i32) {
    %c0_i32 = arith.constant 0 : i32
    %c0_i32_0 = arith.constant 0 : i32
    return %arg0, %c0_i32 : i32, i32
  }
}

</mosaic_0001>

<bundles_post_ra>
// kernel: tpu_custom_call.1
= control target key start
LH: loop header
LB: loop body
LE: loop exit
PB: predicated region body
PF: predicated region fallthrough
CT: control target
= control target key end

     0   :  { %vm153_vm0 = vcmask 523264   ;;  %v1300_v3 = vmov 0   ;;  %s1425_s0 = inlined_call_operand.vmem [shape: bf16[128,64], index: 0, kind: input, shape index: {}]   ;;  %s1426_s1 = inlined_call_operand.vmem [shape: s32[128,1], index: 1, kind: input, shape index: {}]   ;;  %s1427_s2 = inlined_call_operand.vmem [shape: s32[1,128], index: 2, kind: input, shape index: {}]   ;;  %s1428_s3 = inlined_call_operand.hbm [shape: f32[8,128], index: 3, kind: output, shape index: {}]  }
   0x1   :  { %v1246_v0 = vld [vmem:[%s1425_s0 + $0x38] sm:$0xff]   ;;  %v1247_v1 = vld [vmem:[%s1425_s0 + $0x30] sm:$0xff]   ;;  %1244 = vset.pattern.permute.xlu1 %v1300_v3  ;;  %1245 = vset.pattern.permute.xlu0 %v1300_v3  ;;  %v1248_v4 = vld [vmem:[%s1425_s0 + $0x28] sm:$0xff]  }
   0x2   :  { %1223 = vmatprep.subr.msk.bf16.mxu0 %vm153_vm0, %v1246_v0  ;;  %v200_v2 = vsel %vm153_vm0, %v1246_v0, 0  ;;  %1224 = vmatprep.subr.msk.bf16.mxu1 %vm153_vm0, %v1246_v0  ;;  %v197_v5 = vsel %vm153_vm0, %v1247_v1, 0  ;;  %v1254_v6 = vld [vmem:[%s1425_s0] sm:$0xff]   ;;  %v38_v8 = vld [vmem:[%s1426_s1 + $0x8] sm:$0xff] }
   0x3   :  { %1176 = vmatpush3.bf16.xpose.msra.mxu0 %v200_v2  ;;  %1215 = vmatpush3.bf16.xpose.msra.mxu1 %v200_v2  ;;  %v37_v7 = vld [vmem:[%s1426_s1] sm:$0xff] }
   0x4   :  { %1225 = vmatprep.subr.msk.bf16.mxu0 %vm153_vm0, %v1247_v1  ;;  %1226 = vmatprep.subr.msk.bf16.mxu1 %vm153_vm0, %v1247_v1 }
   0x5   :  { %1191 = vmatprep.mubr.msk.bf16.mxu0 %vm153_vm0, %v1254_v6  ;;  %526 = vperm.xlu1 %1244, %v37_v7  }
   0x9   :  { %529 = vperm.xlu1 %1244, %v38_v8  }
   0xb   :  { %1178 = vmatpush3.bf16.xpose.msra.mxu0 %v197_v5  ;;  %1216 = vmatpush3.bf16.xpose.msra.mxu1 %v197_v5 }
   0xc   :  { %1227 = vmatprep.subr.msk.bf16.mxu0 %vm153_vm0, %v1248_v4  ;;  %1228 = vmatprep.subr.msk.bf16.mxu1 %vm153_vm0, %v1248_v4 }
   0xd   :  { %8 = vsyncpa [#allocation3], 0  ;;  %v194_v9 = vsel %vm153_vm0, %v1248_v4, 0  ;;  %v1249_v10 = vld [vmem:[%s1425_s0 + $0x20] sm:$0xff]   ;;  %v1250_v12 = vld [vmem:[%s1425_s0 + $0x18] sm:$0xff]   ;;  %v53_v21 = vlaneseq  ;;  %v1301_v47 = vmov 0.0  }
   0xe   :  { %v191_v11 = vsel %vm153_vm0, %v1249_v10, 0  ;;  %v188_v13 = vsel %vm153_vm0, %v1250_v12, 0  ;;  %v1251_v14 = vld [vmem:[%s1425_s0 + $0x10] sm:$0xff]   ;;  %v1252_v16 = vld [vmem:[%s1425_s0 + $0x8] sm:$0xff]   ;;  %v1253_v18 = vld [vmem:[%s1425_s0] sm:$0xff]   ;;  %vm1043_vm8 = vcmask 7168  }
   0xf   :  { %v185_v15 = vsel %vm153_vm0, %v1251_v14, 0  ;;  %v182_v17 = vsel %vm153_vm0, %v1252_v16, 0  ;;  %v179_v19 = vsel %vm153_vm0, %v1253_v18, 0  ;;  %v1255_v20 = vld [vmem:[%s1425_s0 + $0x8] sm:$0xff]   ;;  %v54_v22 = vand.u32 127, %v53_v21  ;;  %v1256_v53 = vld [vmem:[%s1425_s0 + $0x20] sm:$0xff]  }
  0x10   :  { %v1126_v31 = vld [vmem:[%s1427_s2] ss:$0 sm:$0xff]  ;;  %v1257_v54 = vld [vmem:[%s1425_s0 + $0x28] sm:$0xff]   ;;  %1199 = vmatprep.mubr.msk.bf16.mxu1 %vm153_vm0, %v1256_v53  ;;  %v1258_v55 = vld [vmem:[%s1425_s0 + $0x10] sm:$0xff]  }
  0x11   :  { %vm55_vm1 = vcmp.lt.s32.totalorder %v54_v22, 16  ;;  %v1259_v56 = vld [vmem:[%s1425_s0 + $0x30] sm:$0xff]   ;;  %v1260_v57 = vld [vmem:[%s1425_s0 + $0x18] sm:$0xff]  }
  0x12   :  { %v1261_v58 = vld [vmem:[%s1425_s0 + $0x38] sm:$0xff]   ;;  %s1302_s0 = smov [#allocation2]  }
  0x13   :  { %1180 = vmatpush3.bf16.xpose.msra.mxu0 %v194_v9  ;;  %1217 = vmatpush3.bf16.xpose.msra.mxu1 %v194_v9  ;;  %s1092_s21 = sshll.u32 %s1302_s0, 4  ;;  %s1093_s21 = int_to_ptr.vmem [resolvable:$true] %s1092_s21 }
  0x14   :  { %1229 = vmatprep.subr.msk.bf16.mxu0 %vm153_vm0, %v1249_v10  ;;  %1230 = vmatprep.subr.msk.bf16.mxu1 %vm153_vm0, %v1249_v10  ;;  %s1278_s23 = scalar_lea.vmem %s1093_s21, 128  ;;  %p1283_p1 = scmp.lt.s32.totalorder %s1093_s21, %s1093_s21 }
  0x15   :  { %p1279_p0 = scmp.ne.s32.totalorder %s1093_s21, %s1278_s23  ;;  %p1284_p2 = scmp.lt.s32.totalorder %s1278_s23, %s1278_s23 }
  0x17   :  { %p1285_p3 = por %p1284_p2, %p1283_p1 }
  0x19   :  { %p1286_p4 = pnand %p1285_p3, %p1279_p0 }
  0x1b   :  { %1182 = vmatpush3.bf16.xpose.msra.mxu0 %v191_v11  ;;  %1218 = vmatpush3.bf16.xpose.msra.mxu1 %v191_v11 }
  0x1c   :  { %1231 = vmatprep.subr.msk.bf16.mxu0 %vm153_vm0, %v1250_v12  ;;  %1232 = vmatprep.subr.msk.bf16.mxu1 %vm153_vm0, %v1250_v12 }
  0x23   :  { %1184 = vmatpush3.bf16.xpose.msra.mxu0 %v188_v13  ;;  %1219 = vmatpush3.bf16.xpose.msra.mxu1 %v188_v13 }
  0x24   :  { %1233 = vmatprep.subr.msk.bf16.mxu0 %vm153_vm0, %v1251_v14  ;;  %1234 = vmatprep.subr.msk.bf16.mxu1 %vm153_vm0, %v1251_v14 }
  0x2b   :  { %1186 = vmatpush3.bf16.xpose.msra.mxu0 %v185_v15  ;;  %1220 = vmatpush3.bf16.xpose.msra.mxu1 %v185_v15 }
  0x2c   :  { %1235 = vmatprep.subr.msk.bf16.mxu0 %vm153_vm0, %v1252_v16  ;;  %1236 = vmatprep.subr.msk.bf16.mxu1 %vm153_vm0, %v1252_v16 }
  0x33   :  { %1188 = vmatpush3.bf16.xpose.msra.mxu0 %v182_v17  ;;  %1221 = vmatpush3.bf16.xpose.msra.mxu1 %v182_v17 }
  0x34   :  { %1237 = vmatprep.subr.msk.bf16.mxu0 %vm153_vm0, %v1253_v18  ;;  %1238 = vmatprep.subr.msk.bf16.mxu1 %vm153_vm0, %v1253_v18 }
  0x3b   :  { %1190 = vmatpush3.bf16.xpose.msra.mxu0 %v179_v19  ;;  %1222 = vmatpush3.bf16.xpose.msra.mxu1 %v179_v19 }
  0x42   :  { %1192 = vmatmul.mubr.msk.bf16.vlgmr.msra.gmra.mxu0 %vm153_vm0, %v1255_v20  ;;  %1200 = vmatmul.mubr.msk.bf16.vlgmr.msra.gmra.mxu1 %vm153_vm0, %v1257_v54 }
  0x43   :  { %1195 = vmatprep.mubr.msk.bf16.mxu0 %vm153_vm0, %v1258_v55  ;;  %1203 = vmatprep.mubr.msk.bf16.mxu1 %vm153_vm0, %v1259_v56 }
  0x4a   :  { %1196 = vmatmul.mubr.msk.bf16.gmra.mxu0 %vm153_vm0, %v1260_v57  ;;  %1204 = vmatmul.mubr.msk.bf16.gmra.mxu1 %vm153_vm0, %v1261_v58 }
  0x80   :  { %v527_v32 = vpop.permute.xlu1 %526 }
  0x81   :  { %v577_v37 = vsub.s32 %v527_v32, %v1126_v31 }
  0x83   :  { %v594_v41 = vsub.s32 0, %v577_v37 }
  0x84   :  { %v530_v39 = vpop.permute.xlu1 %529 }
  0x85   :  { %v578_v42 = vsub.s32 %v530_v39, %v1126_v31  ;;  %v1127_v43 = vmin.u32 %v594_v41, %v577_v37 }
  0x87   :  { %v597_v44 = vsub.s32 0, %v578_v42  ;;  %vm641_vm2 = vcmp.le.s32.totalorder %v1127_v43, 3  ;;  %vm657_vm3 = vcmp.gt.s32.totalorder %v1127_v43, 0 }
  0x88   :  { %vm673_vm4 = vmand %vm641_vm2, %vm657_vm3 }
  0x89   :  { %v1128_v46 = vmin.u32 %v597_v44, %v578_v42  ;;  %v1143_v48 = vsel %vm673_vm4, 1.0, %v1301_v47 }
  0x8b   :  { %vm642_vm5 = vcmp.le.s32.totalorder %v1128_v46, 3  ;;  %vm658_vm6 = vcmp.gt.s32.totalorder %v1128_v46, 0 }
  0x8c   :  { %vm674_vm7 = vmand %vm642_vm5, %vm658_vm6 }
  0x8d   :  { %v1144_v50 = vsel %vm674_vm7, 1.0, %v1301_v47 }
 0x102   :  { %v1193_v23 = vpop.f32.mrf.mxu0 }
 0x104   :  { %v236_v24 = vpop.f32.mrf.mxu0 }
 0x105   :  { %v301_v25 = vsel %vm55_vm1, %v236_v24, -1e+30  ;;  %v689_v51 = vsel %vm673_vm4, %v236_v24, 0.0 }
 0x106   :  { %317 = vmax.xlane.f32.xlu0 %v301_v25  ;;  %v1194_v26 = vpop.f32.mrf.mxu0 }
 0x108   :  { %v239_v27 = vpop.f32.mrf.mxu0 }
 0x109   :  { %v302_v28 = vsel %vm55_vm1, %v239_v27, -1e+30  ;;  %v690_v52 = vsel %vm674_vm7, %v239_v27, 0.0 }
 0x10a   :  { %319 = vmax.xlane.f32.xlu0 %v302_v28 }
 0x18f   :  { %v318_v29 = vpop.xlane.xlu0 %317 }
 0x190   :  { %v1385_v30 = vmax.f32 %v318_v29, -1e+30 }
 0x192   :  { %v429_v33 = vsub.f32 %v301_v25, %v1385_v30  ;;  %v365_v59 = vsub.f32 -1e+30, %v1385_v30 }
 0x193   :  { %v320_v34 = vpop.xlane.xlu0 %319 }
 0x194   :  { %v445_v35 = vmul.f32 1.442695, %v429_v33  ;;  %v1391_v36 = vmax.f32 %v320_v34, -1e+30  ;;  %v381_v60 = vmul.f32 1.442695, %v365_v59  ;;  %v1197_v34 = vpop.f32.mrf.mxu0 }
 0x196   :  { %1262 = vpow2.f32 %v445_v35  ;;  %v430_v38 = vsub.f32 %v302_v28, %v1391_v36  ;;  %v366_v61 = vsub.f32 -1e+30, %v1391_v36 }
 0x198   :  { %v447_v40 = vmul.f32 1.442695, %v430_v38  ;;  %v383_v62 = vmul.f32 1.442695, %v366_v61 }
 0x19a   :  { %1264 = vpow2.f32 %v447_v40 }
 0x19b   :  { %1266 = vpow2.f32 %v381_v60 }
 0x19c   :  { %1268 = vpow2.f32 %v383_v62 }
 0x1a3   :  { %v1263_v45 = vpop.eup %1262 }
 0x1a4   :  { %477 = vadd.xlane.f32.xlu0 %v1263_v45 }
 0x1a7   :  { %v1265_v49 = vpop.eup %1264 }
 0x1a8   :  { %785 = vadd.xlane.f32.xlu0 %v1143_v48  ;;  %479 = vadd.xlane.f32.xlu1 %v1265_v49  ;;  %v1267_v63 = vpop.eup %1266 }
 0x1a9   :  { %v413_v0 = vmul.f32 0.0, %v1267_v63  ;;  %v1269_v1 = vpop.eup %1268 }
 0x1aa   :  { %v414_v4 = vmul.f32 0.0, %v1269_v1 }
 0x1ac   :  { %787 = vadd.xlane.f32.xlu0 %v1144_v50 }
 0x1b0   :  { %705 = vadd.xlane.f32.xlu0 %v689_v51 }
 0x1b4   :  { %707 = vadd.xlane.f32.xlu0 %v690_v52 }
 0x22d   :  { %v478_v2 = vpop.xlane.xlu0 %477 }
 0x22e   :  { %v509_v3 = vadd.f32 %v478_v2, %v413_v0 }
 0x230   :  { %1270 = vlog2.f32 %v509_v3 }
 0x231   :  { %v480_v5 = vpop.xlane.xlu1 %479  ;;  %v786_v6 = vpop.xlane.xlu0 %785 }
 0x232   :  { %v510_v7 = vadd.f32 %v480_v5, %v414_v4  ;;  %v881_v9 = vmax.f32 %v786_v6, 1.0 }
 0x234   :  { %1272 = vlog2.f32 %v510_v7 }
 0x235   :  { %v788_v8 = vpop.xlane.xlu0 %787  ;;  %1274 = vrcp.f32 %v881_v9 }
 0x236   :  { %v882_v10 = vmax.f32 %v788_v8, 1.0 }
 0x238   :  { %1276 = vrcp.f32 %v882_v10 }
 0x239   :  { %v706_v15 = vpop.xlane.xlu0 %705 }
 0x23d   :  { %v1271_v11 = vpop.eup %1270  ;;  %v708_v22 = vpop.xlane.xlu0 %707 }
 0x23e   :  { %v834_v12 = vmul.f32 0.6931472, %v1271_v11 }
 0x240   :  { %v865_v13 = vadd.f32 %v834_v12, %v1385_v30  ;;  %v1201_v30 = vpop.f32.mrf.mxu1 }
 0x241   :  { %v1273_v14 = vpop.eup %1272 }
 0x242   :  { %v836_v16 = vmul.f32 0.6931472, %v1273_v14  ;;  %v929_v17 = vmul.f32 %v865_v13, %v786_v6  ;;  %v1275_v21 = vpop.eup %1274  ;;  %v268_v31 = vpop.f32.mrf.mxu1 }
 0x244   :  { %v866_v18 = vadd.f32 %v836_v16, %v1391_v36  ;;  %v945_v19 = vsub.f32 %v706_v15, %v929_v17  ;;  %v1202_v32 = vpop.f32.mrf.mxu1  ;;  %v252_v36 = vpop.f32.mrf.mxu0 }
 0x245   :  { %v1277_v25 = vpop.eup %1276 }
 0x246   :  { %v930_v20 = vmul.f32 %v866_v18, %v788_v8  ;;  %v961_v23 = vmul.f32 %v1275_v21, %v945_v19  ;;  %v271_v33 = vpop.f32.mrf.mxu1  ;;  %v1198_v38 = vpop.f32.mrf.mxu0 }
 0x248   :  { %v946_v24 = vsub.f32 %v708_v22, %v930_v20  ;;  %v1044_v27 = vsel %vm1043_vm8, %v961_v23, 0.0  ;;  %v1205_v35 = vpop.f32.mrf.mxu1  ;;  %v255_v40 = vpop.f32.mrf.mxu0 }
 0x24a   :  { %v962_v26 = vmul.f32 %v1277_v25, %v946_v24  ;;  %v284_v37 = vpop.f32.mrf.mxu1 }
 0x24c   :  { %v1045_v28 = vsel %vm1043_vm8, %v962_v26, 0.0  ;;  %v1206_v39 = vpop.f32.mrf.mxu1 }
 0x24d   :  { %v1046_v29 = vadd.f32 %v1045_v28, %v1044_v27 }
 0x24e   :  { %v287_v41 = vpop.f32.mrf.mxu1 }
 0x24f   :  { %1075 = vadd.xlane.f32.xlu0 %v1046_v29 }
 0x2d8   :  { %v1076_v42 = vpop.xlane.xlu0 %1075 }
 0x2d9   :  { %v1077_v43 = vrot.slane %v1076_v42, 4 }
 0x2db   :  { %v1078_v44 = vadd.f32 %v1077_v43, %v1076_v42 }
 0x2dd   :  { %v1079_v45 = vrot.slane %v1078_v44, 2 }
 0x2df   :  { %v1080_v46 = vadd.f32 %v1079_v45, %v1078_v44 }
 0x2e1   :  { %v1081_v47 = vrot.slane %v1080_v46, 1 }
 0x2e3   :  { %v1082_v48 = vadd.f32 %v1081_v47, %v1080_v46 }
 0x2e5   :  { %1239 = vpush %v1082_v48 }
 0x316   :  { %s1240_s22 = spop %1239 }
 0x317   :  { %v1084_v49 = vstv %s1240_s22 }
 0x318   :  { %1085 = vst [vmem:[#allocation2] sm:$0xff] %v1084_v49 }
 0x319   :  { %1289 = shalt.err (!%p1286_p4)
}
 0x31a   :  { %1095 = dma.vmem_to_hbm [thread:$0]  %s1093_s21, 128, %s1428_s3, [#allocation3]  }
 0x31b   :  { %1298 = dma.done.wait [#allocation3], 128  }
 0x31c   :  { %1299 = vsyncadd [#allocation3], 4294967168 }
 0x31d   :  { %1099 = vsyncpa [#allocation3], 1 }

</bundles_post_ra>
